<compile_context>
chip_gen: v7x
topology: tpu7x:2x2x1
jax: 0.10.0
libtpu: 0.0.40
codegen_flags: <defaults>
</compile_context>

<pallas_src>
import jax
import jax.numpy as jnp
from jax import lax
from jax.experimental import pallas as pl
from jax.experimental.pallas import tpu as pltpu

EPS = 1e-5  # torch.nn.LayerNorm default eps


def _layer_norm_f32(t, g_ref, b_ref):
    """LayerNorm over the last axis, math kept in f32 (g/b refs are (1, D))."""
    t = t.astype(jnp.float32)
    mu = jnp.mean(t, axis=-1, keepdims=True)
    var = jnp.mean(jnp.square(t - mu), axis=-1, keepdims=True)
    return (t - mu) * lax.rsqrt(var + EPS) * g_ref[...] + b_ref[...]


# --------------------------------------------------------------------------
# Phase 1: SpatialTokenGen reduction (accumulated over the batch-block grid).
# --------------------------------------------------------------------------
def _gate_kernel(u_ref, ln_g_ref, ln_b_ref, sq_w_ref, conv_w_ref,
                 sq_b_ref, conv_b_ref, zsum_ref, acc_ref):
    step = pl.program_id(0)
    bb = u_ref.shape[0]  # static batch elements per grid step

    @pl.when(step == 0)
    def _init():
        acc_ref[0] = jnp.float32(0.0)

    un = _layer_norm_f32(u_ref[...], ln_g_ref, ln_b_ref)                    # (bb, S, D)
    # Linear(d_ffn, 1): reduce over the feature axis.
    y = jnp.sum(un * sq_w_ref[...], axis=-1, keepdims=True) + sq_b_ref[0]   # (bb, S, 1)
    # Conv1d(seq_len, 1, 1): reduce over the sequence ("channel") axis, then
    # fold the per-element bias in once (bb copies) and accumulate over batch.
    z_blk = jnp.sum(y * conv_w_ref[...]) + conv_b_ref[0] * jnp.float32(bb)  # scalar
    acc_ref[0] = acc_ref[0] + z_blk

    @pl.when(step == pl.num_programs(0) - 1)
    def _finalize():
        zsum_ref[0] = acc_ref[0]


# --------------------------------------------------------------------------
# Phase 2: LayerNorm(v) + the flag-selected spatial projection (MXU matmul).
# --------------------------------------------------------------------------
def _proj_kernel(flag_ref, v_ref, ln_g_ref, ln_b_ref, w_ref, bias_ref, out_ref):
    del flag_ref  # only consumed by the weight/bias BlockSpec index_maps
    vn = _layer_norm_f32(v_ref[0], ln_g_ref, ln_b_ref)                      # (S, D) f32
    w = w_ref[0]                                                            # (S, S), selected by index_map
    bias = bias_ref[0]                                                      # (S, 1)
    # NOTE: for large shapes cast w/vn to bf16 here (~3x MXU rate, keeps f32
    # accumulation); left in f32 so the 1e-4 reference check stays tight.
    o = jnp.dot(w, vn.astype(w.dtype), preferred_element_type=jnp.float32)  # (S, D)
    out_ref[0] = (o + bias).astype(out_ref.dtype)


def _pick_gate_batch_block(B, S, D, itemsize, budget_bytes):
    """Largest divisor of B whose u-block fits in budget (double-buffered)."""
    bb = 1
    per_elem = S * D * itemsize
    for cand in range(1, B + 1):
        if B % cand == 0 and 2 * cand * per_elem <= budget_bytes:
            bb = cand
    return bb


def spatial_gating_unit(x, params, gate_block_bytes=2 << 20):
    B, S, D2 = x.shape
    D = D2 // 2
    dt = x.dtype
    itemsize = jnp.dtype(dt).itemsize
    smem = pltpu.MemorySpace.SMEM

    # Parameter plumbing (layout only, no math): scalar biases -> 1-D SMEM
    # operands, Conv1d(seq,1,1) weight -> column, projection weights/biases
    # stacked so the scalar-prefetched flag can pick one via the index_map.
    ln_tok_g = params['ln_tok_g'].reshape(1, D).astype(jnp.float32)
    ln_tok_b = params['ln_tok_b'].reshape(1, D).astype(jnp.float32)
    ln_v_g = params['ln_v_g'].reshape(1, D).astype(jnp.float32)
    ln_v_b = params['ln_v_b'].reshape(1, D).astype(jnp.float32)
    sq_w = params['sq_w'].reshape(1, D).astype(jnp.float32)
    sq_b = params['sq_b'].reshape(1).astype(jnp.float32)
    conv_tok_w = params['conv_tok_w'].reshape(S, 1).astype(jnp.float32)
    conv_tok_b = params['conv_tok_b'].reshape(1).astype(jnp.float32)
    proj_w = jnp.stack([params['proj_i_w'], params['proj_ii_w']])           # (2, S, S)
    proj_b = jnp.stack([params['proj_i_b'].reshape(S, 1),
                        params['proj_ii_b'].reshape(S, 1)])                 # (2, S, 1)

    # If d_ffn is lane-aligned (multiple of 128) the u/v halves are carved
    # straight out of x by the BlockSpec index_map (zero-copy: only the needed
    # half is DMA'd).  Otherwise (toy shapes) pre-split with XLA slices so the
    # block shapes stay legal.
    if D % 128 == 0:
        u_arr, v_arr, v_blk = x, x, 1
    else:
        u_arr, v_arr, v_blk = x[..., :D], x[..., D:], 0

    # ---------------- phase 1: gate (tok) ----------------
    bb = _pick_gate_batch_block(B, S, D, itemsize, gate_block_bytes)
    z_sum = pl.pallas_call(
        _gate_kernel,
        out_shape=jax.ShapeDtypeStruct((1,), jnp.float32),
        grid_spec=pltpu.PrefetchScalarGridSpec(
            num_scalar_prefetch=0,
            grid=(B // bb,),
            in_specs=[
                pl.BlockSpec((bb, S, D), lambda b: (b, 0, 0)),                # u block
                pl.BlockSpec((1, D), lambda b: (0, 0)),                       # ln_tok gamma
                pl.BlockSpec((1, D), lambda b: (0, 0)),                       # ln_tok beta
                pl.BlockSpec((1, D), lambda b: (0, 0)),                       # Linear(d_ffn,1) weight
                pl.BlockSpec((S, 1), lambda b: (0, 0)),                       # Conv1d(seq,1,1) weight
                pl.BlockSpec((1,), lambda b: (0,), memory_space=smem),        # Linear bias (scalar)
                pl.BlockSpec((1,), lambda b: (0,), memory_space=smem),        # Conv bias (scalar)
            ],
            out_specs=pl.BlockSpec((1,), lambda b: (0,), memory_space=smem),  # sum_b z_b
            scratch_shapes=[pltpu.SMEM((1,), jnp.float32)],
        ),
        compiler_params=pltpu.CompilerParams(
            dimension_semantics=("arbitrary",)),  # sequential: SMEM accumulator
    )(u_arr, ln_tok_g, ln_tok_b, sq_w, conv_tok_w, sq_b, conv_tok_b)

    # Data-dependent branch: sigmoid of the batch mean picks the projection.
    tok = jax.nn.sigmoid(z_sum[0] / B)
    flag = jnp.where(tok > 0.5, 0, 1).astype(jnp.int32).reshape((1,))  # 0 -> proj_i, 1 -> proj_ii

    # ---------------- phase 2: projection ----------------
    cost = pl.CostEstimate(
        flops=2 * B * S * S * D,
        transcendentals=B * S,                                   # one rsqrt per (b, s)
        bytes_accessed=int(2 * B * S * D * itemsize + S * S * 4 + (2 * D + S + 1) * 4))

    # VMEM budget: double-buffered (S,D) in/out blocks + f32 temps + one weight.
    vmem_need = 2 * S * D * itemsize + 2 * S * D * itemsize + 4 * S * D * 4 + 2 * S * S * 4 + 8 * D * 4
    cp = {"dimension_semantics": ("parallel",)}                  # shard batch over v7x's 2 TCs
    if vmem_need > 24 * 1024 * 1024:
        # Raise the scoped VMEM limit only when the blocks actually need it
        # (keeps headroom on v7x's 64 MiB physical VMEM).
        cp["vmem_limit_bytes"] = min(int(vmem_need * 3 // 2), 48 * 1024 * 1024)

    out = pl.pallas_call(
        _proj_kernel,
        out_shape=jax.ShapeDtypeStruct((B, S, D), dt),
        grid_spec=pltpu.PrefetchScalarGridSpec(
            num_scalar_prefetch=1,                               # the flag
            grid=(B,),
            in_specs=[
                pl.BlockSpec((1, S, D), lambda b, sel: (b, 0, v_blk)),        # v block
                pl.BlockSpec((1, D), lambda b, sel: (0, 0)),                  # ln_v gamma
                pl.BlockSpec((1, D), lambda b, sel: (0, 0)),                  # ln_v beta
                pl.BlockSpec((1, S, S), lambda b, sel: (sel[0], 0, 0)),       # selected W only
                pl.BlockSpec((1, S, 1), lambda b, sel: (sel[0], 0, 0)),       # selected bias only
            ],
            out_specs=pl.BlockSpec((1, S, D), lambda b, sel: (b, 0, 0)),
        ),
        compiler_params=pltpu.CompilerParams(**cp),
        cost_estimate=cost,
    )(flag, v_arr, ln_v_g, ln_v_b, proj_w, proj_b)
    return out


# --------------------------------------------------------------------------
# Pure-JAX reference of the PyTorch module for verification.
# --------------------------------------------------------------------------
def ref_forward(x, p):
    D = x.shape[-1] // 2
    u, v = x[..., :D], x[..., D:]

    def ln(t, g, b):
        m = t.mean(-1, keepdims=True)
        va = jnp.square(t - m).mean(-1, keepdims=True)
        return (t - m) / jnp.sqrt(va + EPS) * g.reshape(-1) + b.reshape(-1)

    un = ln(u, p['ln_tok_g'], p['ln_tok_b'])
    y = un @ p['sq_w'].reshape(-1, 1) + p['sq_b'][0, 0]                 # (B,S,1)
    z = jnp.einsum('bsk,s->bk', y, p['conv_tok_w'][0]) + p['conv_tok_b'][0, 0]
    tok = jax.nn.sigmoid(jnp.mean(z))

    vn = ln(v, p['ln_v_g'], p['ln_v_b'])

    def proj(W, b):
        return jnp.einsum('os,bsd->bod', W, vn) + b[0][None, :, None]

    return jnp.where(tok > 0.5,
                     proj(p['proj_i_w'], p['proj_i_b']),
                     proj(p['proj_ii_w'], p['proj_ii_b']))


def make_params(key, S, D):
    ks = jax.random.split(key, 6)
    return {
        # LayerNorms: PyTorch default init (weight=1, bias=0)
        'ln_tok_g': jnp.ones((1, D), jnp.float32),
        'ln_tok_b': jnp.zeros((1, D), jnp.float32),
        'ln_v_g':   jnp.ones((1, D), jnp.float32),
        'ln_v_b':   jnp.zeros((1, D), jnp.float32),
        # Linear(d_ffn, 1)
        'sq_w': jax.random.normal(ks[0], (1, D), jnp.float32) * 0.1,
        'sq_b': jax.random.normal(ks[1], (1, 1), jnp.float32) * 0.1,
        # Conv1d(seq_len, 1, 1)
        'conv_tok_w': jax.random.normal(ks[2], (1, S), jnp.float32) * 0.1,
        'conv_tok_b': jax.random.normal(ks[3], (1, 1), jnp.float32) * 0.1,
        # Conv1d(seq_len, seq_len, 1); biases constant-initialized to 1.0
        'proj_i_w':  jax.random.normal(ks[4], (S, S), jnp.float32) * 0.1,
        'proj_i_b':  jnp.ones((1, S), jnp.float32),
        'proj_ii_w': jax.random.normal(ks[5], (S, S), jnp.float32) * 0.1,
        'proj_ii_b': jnp.ones((1, S), jnp.float32),
    }


if __name__ == "__main__":
    key = jax.random.PRNGKey(0)

    # Toy shape (pre-split path), a lane-aligned shape (index_map split path),
    # and a forced multi-step batch accumulation in the gate kernel.
    cases = [
        ((2, 8, 16), 2 << 20),
        ((2, 8, 128), 2 << 20),
        ((4, 8, 128), 4 * 8 * 128 * 4 * 2),  # budget -> one batch element / step
    ]
    for (B, S, D), budget in cases:
        kp, kx, key = jax.random.split(key, 3)
        params = make_params(kp, S, D)
        x = jax.random.normal(kx, (B, S, 2 * D), jnp.float32)

        out = jax.block_until_ready(
            spatial_gating_unit(x, params, gate_block_bytes=budget))
        ref = jax.block_until_ready(ref_forward(x, params))

        assert out.shape == (B, S, D)
        assert jnp.allclose(out, ref, atol=1e-4, rtol=1e-4), \
            f"mismatch vs reference at (B,S,D)=({B},{S},{D})"

    print("KERNEL_OK")
</pallas_src>

<mosaic_0001>
module attributes {stable_mosaic.version = 11 : i64} {
  func.func @_gate_kernel(%arg0: i32, %arg1: memref<2x8x16xf32, #tpu.memory_space<vmem>>, %arg2: memref<1x16xf32, #tpu.memory_space<vmem>>, %arg3: memref<1x16xf32, #tpu.memory_space<vmem>>, %arg4: memref<1x16xf32, #tpu.memory_space<vmem>>, %arg5: memref<8x1xf32, #tpu.memory_space<vmem>>, %arg6: memref<1xf32, #tpu.memory_space<smem>>, %arg7: memref<1xf32, #tpu.memory_space<smem>>, %arg8: memref<1xf32, #tpu.memory_space<smem>>, %arg9: memref<1xf32, #tpu.memory_space<smem>>) attributes {dimension_semantics = [#tpu.dimension_semantics<arbitrary>], iteration_bounds = array<i64: 1>, scalar_prefetch = 0 : i64, scratch_operands = 1 : i64, tpu.core_type = #tpu.core_type<tc>, window_params = [{transform_indices = @transform_0, window_bounds = array<i64: 2, 8, 16>}, {pipeline_mode = #tpu.pipeline_mode<synchronous>, transform_indices = @transform_1, window_bounds = array<i64: 1, 16>}, {pipeline_mode = #tpu.pipeline_mode<synchronous>, transform_indices = @transform_2, window_bounds = array<i64: 1, 16>}, {pipeline_mode = #tpu.pipeline_mode<synchronous>, transform_indices = @transform_3, window_bounds = array<i64: 1, 16>}, {pipeline_mode = #tpu.pipeline_mode<synchronous>, transform_indices = @transform_4, window_bounds = array<i64: 8, 1>}, {transform_indices = @transform_5, window_bounds = array<i64: 1>}, {transform_indices = @transform_6, window_bounds = array<i64: 1>}, {transform_indices = @transform_7, window_bounds = array<i64: 1>}]} {
    %c0_i32 = arith.constant 0 : i32
    %0 = arith.cmpi eq, %arg0, %c0_i32 : i32
    %1 = arith.extui %0 : i1 to i32
    %c0_i32_0 = arith.constant 0 : i32
    %2 = arith.cmpi ne, %1, %c0_i32_0 : i32
    scf.if %2 {
      %cst_24 = arith.constant 0.000000e+00 : f32
      %c0_25 = arith.constant 0 : index
      %56 = memref.load %arg9[%c0_25] : memref<1xf32, #tpu.memory_space<smem>>
      memref.store %cst_24, %arg9[%c0_25] : memref<1xf32, #tpu.memory_space<smem>>
    } else {
    }
    %c0 = arith.constant 0 : index
    %c0_1 = arith.constant 0 : index
    %c0_2 = arith.constant 0 : index
    %3 = vector.load %arg1[%c0, %c0_1, %c0_2] : memref<2x8x16xf32, #tpu.memory_space<vmem>>, vector<2x8x16xf32>
    %cst = arith.constant dense<0.000000e+00> : vector<2x8xf32>
    %4 = vector.multi_reduction <add>, %3, %cst [2] : vector<2x8x16xf32> to vector<2x8xf32>
    %5 = vector.shape_cast %4 : vector<2x8xf32> to vector<2x8x1xf32>
    %cst_3 = arith.constant 1.600000e+01 : f32
    %6 = vector.broadcast %cst_3 : f32 to vector<2x8x1xf32>
    %7 = arith.divf %5, %6 : vector<2x8x1xf32>
    %8 = vector.broadcast %7 : vector<2x8x1xf32> to vector<2x8x16xf32>
    %9 = arith.subf %3, %8 : vector<2x8x16xf32>
    %10 = arith.mulf %9, %9 : vector<2x8x16xf32>
    %cst_4 = arith.constant dense<0.000000e+00> : vector<2x8xf32>
    %11 = vector.multi_reduction <add>, %10, %cst_4 [2] : vector<2x8x16xf32> to vector<2x8xf32>
    %12 = vector.shape_cast %11 : vector<2x8xf32> to vector<2x8x1xf32>
    %cst_5 = arith.constant 1.600000e+01 : f32
    %13 = vector.broadcast %cst_5 : f32 to vector<2x8x1xf32>
    %14 = arith.divf %12, %13 : vector<2x8x1xf32>
    %15 = vector.broadcast %7 : vector<2x8x1xf32> to vector<2x8x16xf32>
    %16 = arith.subf %3, %15 : vector<2x8x16xf32>
    %cst_6 = arith.constant 9.99999974E-6 : f32
    %17 = vector.broadcast %cst_6 : f32 to vector<2x8x1xf32>
    %18 = arith.addf %14, %17 : vector<2x8x1xf32>
    %19 = math.rsqrt %18 : vector<2x8x1xf32>
    %20 = vector.broadcast %19 : vector<2x8x1xf32> to vector<2x8x16xf32>
    %21 = arith.mulf %16, %20 : vector<2x8x16xf32>
    %c0_7 = arith.constant 0 : index
    %c0_8 = arith.constant 0 : index
    %22 = vector.load %arg2[%c0_7, %c0_8] : memref<1x16xf32, #tpu.memory_space<vmem>>, vector<1x16xf32>
    %23 = vector.shape_cast %22 : vector<1x16xf32> to vector<1x1x16xf32>
    %24 = vector.broadcast %23 : vector<1x1x16xf32> to vector<2x8x16xf32>
    %25 = arith.mulf %21, %24 : vector<2x8x16xf32>
    %c0_9 = arith.constant 0 : index
    %c0_10 = arith.constant 0 : index
    %26 = vector.load %arg3[%c0_9, %c0_10] : memref<1x16xf32, #tpu.memory_space<vmem>>, vector<1x16xf32>
    %27 = vector.shape_cast %26 : vector<1x16xf32> to vector<1x1x16xf32>
    %28 = vector.broadcast %27 : vector<1x1x16xf32> to vector<2x8x16xf32>
    %29 = arith.addf %25, %28 : vector<2x8x16xf32>
    %c0_11 = arith.constant 0 : index
    %c0_12 = arith.constant 0 : index
    %30 = vector.load %arg4[%c0_11, %c0_12] : memref<1x16xf32, #tpu.memory_space<vmem>>, vector<1x16xf32>
    %31 = vector.shape_cast %30 : vector<1x16xf32> to vector<1x1x16xf32>
    %32 = vector.broadcast %31 : vector<1x1x16xf32> to vector<2x8x16xf32>
    %33 = arith.mulf %29, %32 : vector<2x8x16xf32>
    %cst_13 = arith.constant dense<0.000000e+00> : vector<2x8xf32>
    %34 = vector.multi_reduction <add>, %33, %cst_13 [2] : vector<2x8x16xf32> to vector<2x8xf32>
    %35 = vector.shape_cast %34 : vector<2x8xf32> to vector<2x8x1xf32>
    %c0_14 = arith.constant 0 : index
    %36 = memref.load %arg6[%c0_14] : memref<1xf32, #tpu.memory_space<smem>>
    %37 = vector.broadcast %36 : f32 to vector<2x8x1xf32>
    %38 = arith.addf %35, %37 : vector<2x8x1xf32>
    %c0_15 = arith.constant 0 : index
    %c0_16 = arith.constant 0 : index
    %39 = vector.load %arg5[%c0_15, %c0_16] : memref<8x1xf32, #tpu.memory_space<vmem>>, vector<8x1xf32>
    %40 = vector.shape_cast %39 : vector<8x1xf32> to vector<1x8x1xf32>
    %41 = vector.broadcast %40 : vector<1x8x1xf32> to vector<2x8x1xf32>
    %42 = arith.mulf %38, %41 : vector<2x8x1xf32>
    %43 = vector.shape_cast %42 : vector<2x8x1xf32> to vector<1x2x8x1xf32>
    %cst_17 = arith.constant dense<0.000000e+00> : vector<1xf32>
    %44 = vector.multi_reduction <add>, %43, %cst_17 [1, 2, 3] : vector<1x2x8x1xf32> to vector<1xf32>
    %45 = vector.shape_cast %44 : vector<1xf32> to vector<1x1x1x1xf32>
    %46 = vector.extract %45[0, 0, 0, 0] : f32 from vector<1x1x1x1xf32>
    %c0_18 = arith.constant 0 : index
    %47 = memref.load %arg7[%c0_18] : memref<1xf32, #tpu.memory_space<smem>>
    %cst_19 = arith.constant 2.000000e+00 : f32
    %48 = arith.mulf %47, %cst_19 : f32
    %49 = arith.addf %46, %48 : f32
    %c0_20 = arith.constant 0 : index
    %50 = memref.load %arg9[%c0_20] : memref<1xf32, #tpu.memory_space<smem>>
    %51 = arith.addf %50, %49 : f32
    %c0_21 = arith.constant 0 : index
    %52 = memref.load %arg9[%c0_21] : memref<1xf32, #tpu.memory_space<smem>>
    memref.store %51, %arg9[%c0_21] : memref<1xf32, #tpu.memory_space<smem>>
    %c0_i32_22 = arith.constant 0 : i32
    %53 = arith.cmpi eq, %arg0, %c0_i32_22 : i32
    %54 = arith.extui %53 : i1 to i32
    %c0_i32_23 = arith.constant 0 : i32
    %55 = arith.cmpi ne, %54, %c0_i32_23 : i32
    scf.if %55 {
      %c0_24 = arith.constant 0 : index
      %56 = memref.load %arg9[%c0_24] : memref<1xf32, #tpu.memory_space<smem>>
      %c0_25 = arith.constant 0 : index
      %57 = memref.load %arg8[%c0_25] : memref<1xf32, #tpu.memory_space<smem>>
      memref.store %56, %arg8[%c0_25] : memref<1xf32, #tpu.memory_space<smem>>
    } else {
    }
    return
  }
  func.func @transform_0(%arg0: i32) -> (i32, i32, i32) {
    %c0_i32 = arith.constant 0 : i32
    %c0_i32_0 = arith.constant 0 : i32
    %c0_i32_1 = arith.constant 0 : i32
    return %arg0, %c0_i32, %c0_i32_0 : i32, i32, i32
  }
  func.func @transform_1(%arg0: i32) -> (i32, i32) {
    %c0_i32 = arith.constant 0 : i32
    %c0_i32_0 = arith.constant 0 : i32
    %c0_i32_1 = arith.constant 0 : i32
    return %c0_i32, %c0_i32_0 : i32, i32
  }
  func.func @transform_2(%arg0: i32) -> (i32, i32) {
    %c0_i32 = arith.constant 0 : i32
    %c0_i32_0 = arith.constant 0 : i32
    %c0_i32_1 = arith.constant 0 : i32
    return %c0_i32, %c0_i32_0 : i32, i32
  }
  func.func @transform_3(%arg0: i32) -> (i32, i32) {
    %c0_i32 = arith.constant 0 : i32
    %c0_i32_0 = arith.constant 0 : i32
    %c0_i32_1 = arith.constant 0 : i32
    return %c0_i32, %c0_i32_0 : i32, i32
  }
  func.func @transform_4(%arg0: i32) -> (i32, i32) {
    %c0_i32 = arith.constant 0 : i32
    %c0_i32_0 = arith.constant 0 : i32
    %c0_i32_1 = arith.constant 0 : i32
    return %c0_i32, %c0_i32_0 : i32, i32
  }
  func.func @transform_5(%arg0: i32) -> i32 {
    %c0_i32 = arith.constant 0 : i32
    %c0_i32_0 = arith.constant 0 : i32
    return %c0_i32 : i32
  }
  func.func @transform_6(%arg0: i32) -> i32 {
    %c0_i32 = arith.constant 0 : i32
    %c0_i32_0 = arith.constant 0 : i32
    return %c0_i32 : i32
  }
  func.func @transform_7(%arg0: i32) -> i32 {
    %c0_i32 = arith.constant 0 : i32
    %c0_i32_0 = arith.constant 0 : i32
    return %c0_i32 : i32
  }
}

</mosaic_0001>

<bundles_post_ra>
// kernel: tpu_custom_call.1
= control target key start
LH: loop header
LB: loop body
LE: loop exit
PB: predicated region body
PF: predicated region fallthrough
CT: control target
= control target key end

     0   :  { %vm37_vm0 = vcmask 130048   ;;  %s249_s0 = inlined_call_operand.vmem [shape: f32[2,8,16], index: 0, kind: input, shape index: {}]   ;;  %s250_s1 = inlined_call_operand.vmem [shape: f32[1,16], index: 1, kind: input, shape index: {}]   ;;  %s251_s2 = inlined_call_operand.vmem [shape: f32[1,16], index: 2, kind: input, shape index: {}]   ;;  %s252_s3 = inlined_call_operand.vmem [shape: f32[1,16], index: 3, kind: input, shape index: {}]   ;;  %s253_s4 = inlined_call_operand.vmem [shape: f32[8,1], index: 4, kind: input, shape index: {}]   ;;  %s254_s5 = inlined_call_operand.<no memory space> [shape: f32[1], index: 5, kind: input, shape index: {}]   ;;  %s255_s6 = inlined_call_operand.<no memory space> [shape: f32[1], index: 6, kind: input, shape index: {}]   ;;  %s256_s7 = inlined_call_operand.hbm [shape: f32[1], index: 7, kind: output, shape index: {}]  }
   0x1   :  { %v35_v0 = vld [vmem:[%s249_s0] sm:$0xff]  ;;  %v36_v1 = vld [vmem:[%s249_s0 + $0x8] sm:$0xff] }
   0x2   :  { %14 = vsyncpa [#allocation6], 0  ;;  %v38_v2 = vsel %vm37_vm0, %v35_v0, 0.0  ;;  %v41_v3 = vsel %vm37_vm0, %v36_v1, 0.0  ;;  %v144_v21 = vld [vmem:[%s250_s1] ss:$0 sm:$0xff]  ;;  %v99_v35 = vstv %s254_s5 }
   0x3   :  { %39 = vadd.xlane.f32.xlu0 %v38_v2  ;;  %v145_v23 = vld [vmem:[%s251_s2] ss:$0 sm:$0xff]  ;;  %vm105_vm1 = vcmask 7168   ;;  %s154_s16 = scalar_lea.hbm %s256_s7, 16 }
   0x4   :  { %v146_v26 = vld [vmem:[%s252_s3] ss:$0 sm:$0xff]  ;;  %p155_p0 = scmp.ne.s32.totalorder %s256_s7, %s154_s16  ;;  %p158_p1 = scmp.lt.u32.totalorder %s154_s16, %s256_s7 }
   0x5   :  { %v102_v38 = vld [vmem:[%s253_s4] sm:$0xff]  ;;  %s119_s4 = smul.f32 2.0, %s255_s6 }
   0x6   :  { %p160_p2 = pnand %p158_p1, %p155_p0 }
   0x7   :  { %42 = vadd.xlane.f32.xlu0 %v41_v3 }
  0x90   :  { %v40_v4 = vpop.xlane.xlu0 %39 }
  0x91   :  { %v45_v5 = vmul.f32 0.0625, %v40_v4 }
  0x93   :  { %v47_v6 = vsub.f32 %v35_v0, %v45_v5 }
  0x94   :  { %v43_v7 = vpop.xlane.xlu0 %42 }
  0x95   :  { %v46_v8 = vmul.f32 0.0625, %v43_v7  ;;  %v49_v9 = vmul.f32 %v47_v6, %v47_v6 }
  0x97   :  { %v48_v10 = vsub.f32 %v36_v1, %v46_v8  ;;  %v51_v11 = vsel %vm37_vm0, %v49_v9, 0.0 }
  0x98   :  { %52 = vadd.xlane.f32.xlu1 %v51_v11 }
  0x99   :  { %v50_v12 = vmul.f32 %v48_v10, %v48_v10 }
  0x9b   :  { %v54_v13 = vsel %vm37_vm0, %v50_v12, 0.0 }
  0x9c   :  { %55 = vadd.xlane.f32.xlu1 %v54_v13 }
 0x125   :  { %v53_v14 = vpop.xlane.xlu1 %52 }
 0x126   :  { %v57_v15 = vmul.f32 0.0625, %v53_v14 }
 0x128   :  { %v59_v16 = vadd.f32 1e-05, %v57_v15 }
 0x129   :  { %v56_v17 = vpop.xlane.xlu1 %55 }
 0x12a   :  { %150 = vrsqrt.f32 %v59_v16  ;;  %v58_v18 = vmul.f32 0.0625, %v56_v17 }
 0x12c   :  { %v60_v19 = vadd.f32 1e-05, %v58_v18 }
 0x12e   :  { %152 = vrsqrt.f32 %v60_v19 }
 0x134   :  { %v151_v20 = vpop.eup %150 }
 0x135   :  { %v63_v22 = vmul.f32 %v151_v20, %v47_v6 }
 0x137   :  { %v72_v24 = vmul.f32 %v144_v21, %v63_v22 }
 0x138   :  { %v153_v25 = vpop.eup %152 }
 0x139   :  { %v81_v27 = vadd.f32 %v145_v23, %v72_v24  ;;  %v64_v28 = vmul.f32 %v153_v25, %v48_v10 }
 0x13b   :  { %v90_v29 = vmul.f32 %v146_v26, %v81_v27  ;;  %v73_v30 = vmul.f32 %v144_v21, %v64_v28 }
 0x13d   :  { %v92_v31 = vsel %vm37_vm0, %v90_v29, 0.0  ;;  %v82_v32 = vadd.f32 %v145_v23, %v73_v30 }
 0x13e   :  { %93 = vadd.xlane.f32.xlu0 %v92_v31 }
 0x13f   :  { %v91_v33 = vmul.f32 %v146_v26, %v82_v32 }
 0x141   :  { %v95_v34 = vsel %vm37_vm0, %v91_v33, 0.0 }
 0x142   :  { %96 = vadd.xlane.f32.xlu1 %v95_v34 }
 0x1cb   :  { %v94_v36 = vpop.xlane.xlu0 %93 }
 0x1cc   :  { %v100_v37 = vadd.f32 %v99_v35, %v94_v36 }
 0x1ce   :  { %v103_v40 = vmul.f32 %v102_v38, %v100_v37 }
 0x1cf   :  { %v97_v39 = vpop.xlane.xlu1 %96 }
 0x1d0   :  { %v101_v41 = vadd.f32 %v99_v35, %v97_v39  ;;  %v106_v43 = vsel %vm105_vm1, %v103_v40, 0.0 }
 0x1d2   :  { %v104_v42 = vmul.f32 %v102_v38, %v101_v41 }
 0x1d4   :  { %v107_v44 = vsel %vm105_vm1, %v104_v42, 0.0 }
 0x1d5   :  { %v108_v45 = vadd.f32 %v107_v44, %v106_v43 }
 0x1d7   :  { %109 = vadd.xlane.f32.xlu0 %v108_v45 }
 0x264   :  { %v110_v46 = vpop.xlane.xlu0 %109 }
 0x265   :  { %v111_v47 = vrot.slane %v110_v46, 4 }
 0x267   :  { %v112_v48 = vadd.f32 %v111_v47, %v110_v46 }
 0x269   :  { %v113_v49 = vrot.slane %v112_v48, 2 }
 0x26b   :  { %v114_v50 = vadd.f32 %v113_v49, %v112_v48 }
 0x26d   :  { %v115_v51 = vrot.slane %v114_v50, 1 }
 0x26f   :  { %v116_v52 = vadd.f32 %v115_v51, %v114_v50 }
 0x271   :  { %147 = vpush %v116_v52 }
 0x2a2   :  { %s148_s12 = spop %147 }
 0x2a3   :  { %s120_s13 = sadd.f32 %s148_s12, %s119_s4 }
 0x2a5   :  { %130 = sst [smem:[#allocation5]] %s120_s13 }
 0x2a6   :  { %163 = shalt.err (!%p160_p2)
}
 0x2a7   :  { %s166_s21 = smov [#allocation5]  }
 0x2a8   :  { %138 = dma.smem_to_hbm %s166_s21, 16, %s256_s7, [#allocation6]  }
 0x2a9   :  { %164 = dma.done.wait [#allocation6], 16  }
 0x2aa   :  { %165 = vsyncadd [#allocation6], 4294967280 }
 0x2ab   :  { %142 = sfence }
 0x2ac   :  { %143 = vsyncpa [#allocation6], 1 }

</bundles_post_ra>
